<compile_context>
chip_gen: v6e
topology: v6e:2x2x1
jax: 0.10.0
libtpu: 0.0.40
codegen_flags: <defaults>
</compile_context>

<pallas_src>
import jax
import jax.numpy as jnp
from jax import lax
from jax.experimental import pallas as pl
from jax.experimental.pallas import tpu as pltpu


def _round_up(x, m):
    return ((x + m - 1) // m) * m


def _mapping_manifold_kernel(x_ref, lat_ref,
                             w1_ref,
                             w2_ref, b2_ref,
                             wl0_ref, bl0_ref,
                             wl1_ref, bl1_ref,
                             wlastT_ref, blastT_ref,
                             o_ref):
    # x_ref:      (1, tm, Din)       row tile of one batch element
    # lat_ref:    (1, 1, code)       effective bias = b1 + latent[b]
    # wlastT_ref: (Dp, hidden)       last layer, transposed + sublane-padded
    # blastT_ref: (Dp, 1)
    # o_ref:      (1, Dp, tm)        transposed output tile (rows on lane axis)
    cdt = w1_ref.dtype  # compute dtype for MXU operands (bf16 or f32)

    x = x_ref[0]                        # (tm, Din)
    lat = lat_ref[0]                    # (1, code), f32

    h = jnp.dot(x, w1_ref[...], preferred_element_type=jnp.float32)
    h = jnp.maximum(h + lat, 0.0)       # bias + latent pre-folded

    h = jnp.dot(h.astype(cdt), w2_ref[...],
                preferred_element_type=jnp.float32) + b2_ref[...]
    h = jnp.maximum(h, 0.0)

    h = jnp.dot(h.astype(cdt), wl0_ref[...],
                preferred_element_type=jnp.float32) + bl0_ref[...]
    h = jnp.maximum(h, 0.0)

    h = jnp.dot(h.astype(cdt), wl1_ref[...],
                preferred_element_type=jnp.float32) + bl1_ref[...]
    h = jnp.maximum(h, 0.0)

    # Last layer computed transposed: yT[d, m] = sum_k wlastT[d, k] * h[m, k]
    # (NT matmul on the MXU), so the output block is (Dp, tm) with rows in the
    # 128-lane axis -> ~16x fewer output HBM bytes than padding Dout to 128.
    yT = lax.dot_general(
        wlastT_ref[...], h.astype(cdt),
        dimension_numbers=(((1,), (1,)), ((), ())),
        preferred_element_type=jnp.float32) + blastT_ref[...]
    o_ref[0] = yT.astype(o_ref.dtype)


def _full_spec(shape):
    nd = len(shape)
    return pl.BlockSpec(shape, lambda b, i, _nd=nd: (0,) * _nd)


def mapping_manifold_forward(x, latent, params, *,
                             compute_dtype=jnp.bfloat16, tm=512):
    """x: (B, N, input_dim) f32, latent: (B, code_size) f32.

    compute_dtype=jnp.bfloat16 (default) feeds bf16 operands to the MXU
    (bf16-native on v5e/v6e/v7x) with f32 accumulation and f32 biases.
    Pass compute_dtype=jnp.float32 for exact module semantics.
    """
    B, N, Din = x.shape
    code = latent.shape[1]
    hidden = params["w2"].shape[1]
    Dout = params["w_last"].shape[1]
    out_dtype = x.dtype
    cdt = jnp.dtype(compute_dtype)

    # --- row tiling (per batch element) --------------------------------------
    tm_eff = min(tm, _round_up(N, 8))
    N_pad = _round_up(N, tm_eff)
    Dp = _round_up(Dout, 8)             # output channels live in sublanes

    x_p = x.astype(cdt)
    if N_pad != N:
        x_p = jnp.pad(x_p, ((0, 0), (0, N_pad - N), (0, 0)))

    # Fold latent into linear1's bias (kept f32: adds onto the f32 accumulator).
    b1_eff = (params["b1"] + latent).astype(jnp.float32).reshape(B, 1, code)

    # Last layer stored transposed + sublane-padded: (Dp, hidden) / (Dp, 1).
    w_lastT = jnp.pad(params["w_last"].T, ((0, Dp - Dout), (0, 0)))
    b_lastT = jnp.pad(params["b_last"].reshape(Dout, 1), ((0, Dp - Dout), (0, 0)))

    weights = (params["w1"].astype(cdt),
               params["w2"].astype(cdt), params["b2"].astype(jnp.float32),
               params["wl0"].astype(cdt), params["bl0"].astype(jnp.float32),
               params["wl1"].astype(cdt), params["bl1"].astype(jnp.float32),
               w_lastT.astype(cdt), b_lastT.astype(jnp.float32))

    grid = (B, N_pad // tm_eff)

    in_specs = [
        pl.BlockSpec((1, tm_eff, Din), lambda b, i: (b, i, 0)),   # x row tile
        pl.BlockSpec((1, 1, code), lambda b, i: (b, 0, 0)),       # b1 + latent[b]
    ] + [_full_spec(w.shape) for w in weights]                    # whole weights
    out_spec = pl.BlockSpec((1, Dp, tm_eff), lambda b, i: (b, 0, i))

    # Honest cost hint: true Dout in the flops term, actual output bytes.
    M_comp = B * N_pad
    flops = 2 * M_comp * (Din * code + code * hidden
                          + 2 * hidden * hidden + hidden * Dout)
    bytes_accessed = (x_p.size * x_p.dtype.itemsize
                      + b1_eff.size * b1_eff.dtype.itemsize
                      + sum(w.size * w.dtype.itemsize for w in weights)
                      + B * Dp * N_pad * jnp.dtype(out_dtype).itemsize)

    yT = pl.pallas_call(
        _mapping_manifold_kernel,
        out_shape=jax.ShapeDtypeStruct((B, Dp, N_pad), out_dtype),
        grid_spec=pltpu.PrefetchScalarGridSpec(
            num_scalar_prefetch=0,
            grid=grid,
            in_specs=in_specs,
            out_specs=out_spec,
        ),
        compiler_params=pltpu.CompilerParams(
            dimension_semantics=("parallel", "parallel")),
        cost_estimate=pl.CostEstimate(
            flops=flops, transcendentals=0, bytes_accessed=bytes_accessed),
    )(x_p, b1_eff, *weights)

    # (B, Dp, N_pad) -> (B, N, Dout)
    return jnp.swapaxes(yT[:, :Dout, :N], 1, 2)


def init_params(key, input_dim, code_size, hidden, output_dim):
    """Deterministic synthetic init. Weights stored (in, out); biases (1, out)."""
    ks = jax.random.split(key, 10)

    def lin(k, fan_in, fan_out, scale=0.1):
        kw, kb = jax.random.split(k)
        w = scale * jax.random.normal(kw, (fan_in, fan_out), jnp.float32)
        b = scale * jax.random.normal(kb, (1, fan_out), jnp.float32)
        return w, b

    w1, b1 = lin(ks[0], input_dim, code_size)
    w2, b2 = lin(ks[1], code_size, hidden)
    wl0, bl0 = lin(ks[2], hidden, hidden)
    wl1, bl1 = lin(ks[3], hidden, hidden)
    w_last, b_last = lin(ks[4], hidden, output_dim)
    return dict(w1=w1, b1=b1, w2=w2, b2=b2,
                wl0=wl0, bl0=bl0, wl1=wl1, bl1=bl1,
                w_last=w_last, b_last=b_last)


def reference_forward(x, latent, p):
    h = jnp.maximum(x @ p["w1"] + p["b1"] + latent[:, None, :], 0.0)
    h = jnp.maximum(h @ p["w2"] + p["b2"], 0.0)
    h = jnp.maximum(h @ p["wl0"] + p["bl0"], 0.0)
    h = jnp.maximum(h @ p["wl1"] + p["bl1"], 0.0)
    return h @ p["w_last"] + p["b_last"]


if __name__ == "__main__":
    # Small shapes consistent with the module's forward:
    #   x: (B, N, input_dim), latent: (B, code_size)
    B, N = 2, 64
    input_dim, code_size, hidden, output_dim = 3, 16, 32, 3

    key = jax.random.PRNGKey(0)
    kx, kl, kp = jax.random.split(key, 3)
    x = jax.random.normal(kx, (B, N, input_dim), jnp.float32)
    latent = jax.random.normal(kl, (B, code_size), jnp.float32)
    params = init_params(kp, input_dim, code_size, hidden, output_dim)

    ref = reference_forward(x, latent, params)

    # f32 compute path: exact module semantics.
    out_f32 = mapping_manifold_forward(
        x, latent, params, compute_dtype=jnp.float32)
    out_f32 = jax.block_until_ready(out_f32)
    assert out_f32.shape == (B, N, output_dim)
    assert jnp.allclose(out_f32, ref, atol=1e-5, rtol=1e-5)

    # Default bf16 compute path (bf16 MXU operands, f32 accumulation).
    out_bf16 = mapping_manifold_forward(x, latent, params)
    out_bf16 = jax.block_until_ready(out_bf16)
    assert out_bf16.shape == (B, N, output_dim)
    assert bool(jnp.all(jnp.isfinite(out_bf16)))
    assert jnp.allclose(out_bf16, ref, atol=5e-2, rtol=5e-2)

    print("KERNEL_OK")
</pallas_src>

<mosaic_0001>
module attributes {stable_mosaic.version = 11 : i64} {
  func.func @_mapping_manifold_kernel(%arg0: i32, %arg1: i32, %arg2: memref<1x64x3xf32, #tpu.memory_space<vmem>>, %arg3: memref<1x1x16xf32, #tpu.memory_space<vmem>>, %arg4: memref<3x16xf32, #tpu.memory_space<vmem>>, %arg5: memref<16x32xf32, #tpu.memory_space<vmem>>, %arg6: memref<1x32xf32, #tpu.memory_space<vmem>>, %arg7: memref<32x32xf32, #tpu.memory_space<vmem>>, %arg8: memref<1x32xf32, #tpu.memory_space<vmem>>, %arg9: memref<32x32xf32, #tpu.memory_space<vmem>>, %arg10: memref<1x32xf32, #tpu.memory_space<vmem>>, %arg11: memref<8x32xf32, #tpu.memory_space<vmem>>, %arg12: memref<8x1xf32, #tpu.memory_space<vmem>>, %arg13: memref<1x8x64xf32, #tpu.memory_space<vmem>>) attributes {dimension_semantics = [#tpu.dimension_semantics<parallel>, #tpu.dimension_semantics<parallel>], iteration_bounds = array<i64: 2, 1>, scalar_prefetch = 0 : i64, scratch_operands = 0 : i64, tpu.core_type = #tpu.core_type<tc>, window_params = [{transform_indices = @transform_0, window_bounds = array<i64: 1, 64, 3>}, {transform_indices = @transform_1, window_bounds = array<i64: 1, 1, 16>}, {pipeline_mode = #tpu.pipeline_mode<synchronous>, transform_indices = @transform_2, window_bounds = array<i64: 3, 16>}, {pipeline_mode = #tpu.pipeline_mode<synchronous>, transform_indices = @transform_3, window_bounds = array<i64: 16, 32>}, {pipeline_mode = #tpu.pipeline_mode<synchronous>, transform_indices = @transform_4, window_bounds = array<i64: 1, 32>}, {pipeline_mode = #tpu.pipeline_mode<synchronous>, transform_indices = @transform_5, window_bounds = array<i64: 32, 32>}, {pipeline_mode = #tpu.pipeline_mode<synchronous>, transform_indices = @transform_6, window_bounds = array<i64: 1, 32>}, {pipeline_mode = #tpu.pipeline_mode<synchronous>, transform_indices = @transform_7, window_bounds = array<i64: 32, 32>}, {pipeline_mode = #tpu.pipeline_mode<synchronous>, transform_indices = @transform_8, window_bounds = array<i64: 1, 32>}, {pipeline_mode = #tpu.pipeline_mode<synchronous>, transform_indices = @transform_9, window_bounds = array<i64: 8, 32>}, {pipeline_mode = #tpu.pipeline_mode<synchronous>, transform_indices = @transform_10, window_bounds = array<i64: 8, 1>}, {transform_indices = @transform_11, window_bounds = array<i64: 1, 8, 64>}]} {
    %c0 = arith.constant 0 : index
    %c0_0 = arith.constant 0 : index
    %c0_1 = arith.constant 0 : index
    %0 = vector.load %arg2[%c0, %c0_0, %c0_1] : memref<1x64x3xf32, #tpu.memory_space<vmem>>, vector<1x64x3xf32>
    %1 = vector.shape_cast %0 : vector<1x64x3xf32> to vector<64x3xf32>
    %c0_2 = arith.constant 0 : index
    %c0_3 = arith.constant 0 : index
    %c0_4 = arith.constant 0 : index
    %2 = vector.load %arg3[%c0_2, %c0_3, %c0_4] : memref<1x1x16xf32, #tpu.memory_space<vmem>>, vector<1x1x16xf32>
    %3 = vector.shape_cast %2 : vector<1x1x16xf32> to vector<1x16xf32>
    %c0_5 = arith.constant 0 : index
    %c0_6 = arith.constant 0 : index
    %4 = vector.load %arg4[%c0_5, %c0_6] : memref<3x16xf32, #tpu.memory_space<vmem>>, vector<3x16xf32>
    %cst = arith.constant dense<0.000000e+00> : vector<64x16xf32>
    %5 = tpu.matmul %1, %4, %cst {dimension_numbers = #tpu.dot_dimension_numbers<[1], [0], [0], [1], [0, 0, 1, 1], [], []>} : vector<64x3xf32>, vector<3x16xf32>, vector<64x16xf32> -> vector<64x16xf32>
    %6 = vector.broadcast %3 : vector<1x16xf32> to vector<64x16xf32>
    %7 = arith.addf %5, %6 : vector<64x16xf32>
    %cst_7 = arith.constant 0.000000e+00 : f32
    %8 = vector.broadcast %cst_7 : f32 to vector<64x16xf32>
    %9 = arith.maximumf %7, %8 : vector<64x16xf32>
    %c0_8 = arith.constant 0 : index
    %c0_9 = arith.constant 0 : index
    %10 = vector.load %arg5[%c0_8, %c0_9] : memref<16x32xf32, #tpu.memory_space<vmem>>, vector<16x32xf32>
    %cst_10 = arith.constant dense<0.000000e+00> : vector<64x32xf32>
    %11 = tpu.matmul %9, %10, %cst_10 {dimension_numbers = #tpu.dot_dimension_numbers<[1], [0], [0], [1], [0, 0, 1, 1], [], []>} : vector<64x16xf32>, vector<16x32xf32>, vector<64x32xf32> -> vector<64x32xf32>
    %c0_11 = arith.constant 0 : index
    %c0_12 = arith.constant 0 : index
    %12 = vector.load %arg6[%c0_11, %c0_12] : memref<1x32xf32, #tpu.memory_space<vmem>>, vector<1x32xf32>
    %13 = vector.broadcast %12 : vector<1x32xf32> to vector<64x32xf32>
    %14 = arith.addf %11, %13 : vector<64x32xf32>
    %cst_13 = arith.constant 0.000000e+00 : f32
    %15 = vector.broadcast %cst_13 : f32 to vector<64x32xf32>
    %16 = arith.maximumf %14, %15 : vector<64x32xf32>
    %c0_14 = arith.constant 0 : index
    %c0_15 = arith.constant 0 : index
    %17 = vector.load %arg7[%c0_14, %c0_15] : memref<32x32xf32, #tpu.memory_space<vmem>>, vector<32x32xf32>
    %cst_16 = arith.constant dense<0.000000e+00> : vector<64x32xf32>
    %18 = tpu.matmul %16, %17, %cst_16 {dimension_numbers = #tpu.dot_dimension_numbers<[1], [0], [0], [1], [0, 0, 1, 1], [], []>} : vector<64x32xf32>, vector<32x32xf32>, vector<64x32xf32> -> vector<64x32xf32>
    %c0_17 = arith.constant 0 : index
    %c0_18 = arith.constant 0 : index
    %19 = vector.load %arg8[%c0_17, %c0_18] : memref<1x32xf32, #tpu.memory_space<vmem>>, vector<1x32xf32>
    %20 = vector.broadcast %19 : vector<1x32xf32> to vector<64x32xf32>
    %21 = arith.addf %18, %20 : vector<64x32xf32>
    %cst_19 = arith.constant 0.000000e+00 : f32
    %22 = vector.broadcast %cst_19 : f32 to vector<64x32xf32>
    %23 = arith.maximumf %21, %22 : vector<64x32xf32>
    %c0_20 = arith.constant 0 : index
    %c0_21 = arith.constant 0 : index
    %24 = vector.load %arg9[%c0_20, %c0_21] : memref<32x32xf32, #tpu.memory_space<vmem>>, vector<32x32xf32>
    %cst_22 = arith.constant dense<0.000000e+00> : vector<64x32xf32>
    %25 = tpu.matmul %23, %24, %cst_22 {dimension_numbers = #tpu.dot_dimension_numbers<[1], [0], [0], [1], [0, 0, 1, 1], [], []>} : vector<64x32xf32>, vector<32x32xf32>, vector<64x32xf32> -> vector<64x32xf32>
    %c0_23 = arith.constant 0 : index
    %c0_24 = arith.constant 0 : index
    %26 = vector.load %arg10[%c0_23, %c0_24] : memref<1x32xf32, #tpu.memory_space<vmem>>, vector<1x32xf32>
    %27 = vector.broadcast %26 : vector<1x32xf32> to vector<64x32xf32>
    %28 = arith.addf %25, %27 : vector<64x32xf32>
    %cst_25 = arith.constant 0.000000e+00 : f32
    %29 = vector.broadcast %cst_25 : f32 to vector<64x32xf32>
    %30 = arith.maximumf %28, %29 : vector<64x32xf32>
    %c0_26 = arith.constant 0 : index
    %c0_27 = arith.constant 0 : index
    %31 = vector.load %arg11[%c0_26, %c0_27] : memref<8x32xf32, #tpu.memory_space<vmem>>, vector<8x32xf32>
    %cst_28 = arith.constant dense<0.000000e+00> : vector<8x64xf32>
    %32 = tpu.matmul %31, %30, %cst_28 {dimension_numbers = #tpu.dot_dimension_numbers<[1], [1], [0], [0], [0, 0, 1, 0], [], []>} : vector<8x32xf32>, vector<64x32xf32>, vector<8x64xf32> -> vector<8x64xf32>
    %c0_29 = arith.constant 0 : index
    %c0_30 = arith.constant 0 : index
    %33 = vector.load %arg12[%c0_29, %c0_30] : memref<8x1xf32, #tpu.memory_space<vmem>>, vector<8x1xf32>
    %34 = vector.broadcast %33 : vector<8x1xf32> to vector<8x64xf32>
    %35 = arith.addf %32, %34 : vector<8x64xf32>
    %c0_31 = arith.constant 0 : index
    %c0_32 = arith.constant 0 : index
    %c0_33 = arith.constant 0 : index
    %36 = vector.load %arg13[%c0_31, %c0_32, %c0_33] : memref<1x8x64xf32, #tpu.memory_space<vmem>>, vector<1x8x64xf32>
    %37 = vector.shape_cast %36 : vector<1x8x64xf32> to vector<8x64xf32>
    %38 = vector.shape_cast %35 : vector<8x64xf32> to vector<1x8x64xf32>
    tpu.vector_store %arg13[%c0_31, %c0_32, %c0_33], %38 {strides = array<i32>} : memref<1x8x64xf32, #tpu.memory_space<vmem>>, vector<1x8x64xf32>,
    return
  }
  func.func @transform_0(%arg0: i32, %arg1: i32) -> (i32, i32, i32) {
    %c0_i32 = arith.constant 0 : i32
    %c0_i32_0 = arith.constant 0 : i32
    return %arg0, %arg1, %c0_i32 : i32, i32, i32
  }
  func.func @transform_1(%arg0: i32, %arg1: i32) -> (i32, i32, i32) {
    %c0_i32 = arith.constant 0 : i32
    %c0_i32_0 = arith.constant 0 : i32
    %c0_i32_1 = arith.constant 0 : i32
    return %arg0, %c0_i32, %c0_i32_0 : i32, i32, i32
  }
  func.func @transform_2(%arg0: i32, %arg1: i32) -> (i32, i32) {
    %c0_i32 = arith.constant 0 : i32
    %c0_i32_0 = arith.constant 0 : i32
    %c0_i32_1 = arith.constant 0 : i32
    return %c0_i32, %c0_i32_0 : i32, i32
  }
  func.func @transform_3(%arg0: i32, %arg1: i32) -> (i32, i32) {
    %c0_i32 = arith.constant 0 : i32
    %c0_i32_0 = arith.constant 0 : i32
    %c0_i32_1 = arith.constant 0 : i32
    return %c0_i32, %c0_i32_0 : i32, i32
  }
  func.func @transform_4(%arg0: i32, %arg1: i32) -> (i32, i32) {
    %c0_i32 = arith.constant 0 : i32
    %c0_i32_0 = arith.constant 0 : i32
    %c0_i32_1 = arith.constant 0 : i32
    return %c0_i32, %c0_i32_0 : i32, i32
  }
  func.func @transform_5(%arg0: i32, %arg1: i32) -> (i32, i32) {
    %c0_i32 = arith.constant 0 : i32
    %c0_i32_0 = arith.constant 0 : i32
    %c0_i32_1 = arith.constant 0 : i32
    return %c0_i32, %c0_i32_0 : i32, i32
  }
  func.func @transform_6(%arg0: i32, %arg1: i32) -> (i32, i32) {
    %c0_i32 = arith.constant 0 : i32
    %c0_i32_0 = arith.constant 0 : i32
    %c0_i32_1 = arith.constant 0 : i32
    return %c0_i32, %c0_i32_0 : i32, i32
  }
  func.func @transform_7(%arg0: i32, %arg1: i32) -> (i32, i32) {
    %c0_i32 = arith.constant 0 : i32
    %c0_i32_0 = arith.constant 0 : i32
    %c0_i32_1 = arith.constant 0 : i32
    return %c0_i32, %c0_i32_0 : i32, i32
  }
  func.func @transform_8(%arg0: i32, %arg1: i32) -> (i32, i32) {
    %c0_i32 = arith.constant 0 : i32
    %c0_i32_0 = arith.constant 0 : i32
    %c0_i32_1 = arith.constant 0 : i32
    return %c0_i32, %c0_i32_0 : i32, i32
  }
  func.func @transform_9(%arg0: i32, %arg1: i32) -> (i32, i32) {
    %c0_i32 = arith.constant 0 : i32
    %c0_i32_0 = arith.constant 0 : i32
    %c0_i32_1 = arith.constant 0 : i32
    return %c0_i32, %c0_i32_0 : i32, i32
  }
  func.func @transform_10(%arg0: i32, %arg1: i32) -> (i32, i32) {
    %c0_i32 = arith.constant 0 : i32
    %c0_i32_0 = arith.constant 0 : i32
    %c0_i32_1 = arith.constant 0 : i32
    return %c0_i32, %c0_i32_0 : i32, i32
  }
  func.func @transform_11(%arg0: i32, %arg1: i32) -> (i32, i32, i32) {
    %c0_i32 = arith.constant 0 : i32
    %c0_i32_0 = arith.constant 0 : i32
    return %arg0, %c0_i32, %arg1 : i32, i32, i32
  }
}

</mosaic_0001>

<bundles_post_ra>
// kernel: tpu_custom_call.1
= control target key start
LH: loop header
LB: loop body
LE: loop exit
PB: predicated region body
PF: predicated region fallthrough
CT: control target
= control target key end

     0   :  { %s1839_s0 = inlined_call_operand.vmem [shape: f32[2,64,3], index: 0, kind: input, shape index: {}]   ;;  %s1840_s1 = inlined_call_operand.vmem [shape: f32[2,1,16], index: 1, kind: input, shape index: {}]   ;;  %s1841_s2 = inlined_call_operand.vmem [shape: f32[3,16], index: 2, kind: input, shape index: {}]   ;;  %s1842_s3 = inlined_call_operand.vmem [shape: f32[16,32], index: 3, kind: input, shape index: {}]   ;;  %s1843_s4 = inlined_call_operand.vmem [shape: f32[1,32], index: 4, kind: input, shape index: {}]   ;;  %s1844_s5 = inlined_call_operand.vmem [shape: f32[32,32], index: 5, kind: input, shape index: {}]   ;;  %s1845_s6 = inlined_call_operand.vmem [shape: f32[1,32], index: 6, kind: input, shape index: {}]   ;;  %s1846_s7 = inlined_call_operand.vmem [shape: f32[32,32], index: 7, kind: input, shape index: {}]   ;;  %s1847_s8 = inlined_call_operand.vmem [shape: f32[1,32], index: 8, kind: input, shape index: {}]   ;;  %s1848_s9 = inlined_call_operand.vmem [shape: f32[8,32], index: 9, kind: input, shape index: {}]   ;;  %s1849_s10 = inlined_call_operand.vmem [shape: f32[8,1], index: 10, kind: input, shape index: {}]   ;;  %s1850_s11 = inlined_call_operand.hbm [shape: f32[2,8,64], index: 11, kind: output, shape index: {}]  }
   0x1   :  { %1851 = sst [smem:[#allocation5_spill]] %s1839_s0 }
   0x2   :  { %1852 = sst [smem:[#allocation6_spill]] %s1840_s1 }
   0x3   :  { %16 = vsyncpa [#allocation3], 0 }
   0x4   :  { %18 = vsyncpa [#allocation3 + $0x1], 0  ;;  %s1638_s17 = smov 0   ;;  %s1640_s18 = smov 0  }
   0x5   :  { %s1642_s19 = smov 0   ;;  %s1644_s20 = smov 0  }
   0x6   :  { %s1646_s21 = smov 0   ;;  %s1648_s22 = smov 0  }
   0x7 LB: > { %s1235_s23 = sadd.s32 4294967295, %s1572_s22   ;;  %s1236_s24 = sadd.s32 4294967294, %s1572_s22   ;;  %s1572_s22 = sphi %s1648_s22, %s24_s22   ;;  %s1568_s21 = sphi %s1646_s21, %s1861_s21   ;;  %s1564_s20 = sphi %s1644_s20, %s1860_s20   ;;  %s1560_s19 = sphi %s1642_s19, %s1859_s19   ;;  %s1556_s18 = sphi %s1640_s18, %s1858_s18   ;;  %s1552_s17 = sphi %s1638_s17, %s1857_s17  }
   0x8   : > { %s36_s25 = sadd.s32 1, %s1568_s21  ;;  %s288_s26 = sadd.s32 1, %s1560_s19 }
   0x9   : > { %p38_p0 = scmp.ge.s32.totalorder %s36_s25, 2  ;;  %p298_p1 = scmp.ne.s32.totalorder %s1560_s19, %s1556_s18 }
   0xa   : > { %p299_p2 = scmp.eq.s32.totalorder %s1235_s23, 1  ;;  %p304_p3 = scmp.ne.s32.totalorder %s1556_s18, %s1552_s17 }
   0xb   : > { %s1863_s25 = smov (%p38_p0, %s36_s25), 0  ;;  %p305_p5 = scmp.eq.s32.totalorder %s1236_s24, 1 }
   0xc   : > { %p1678_p4 = por %p299_p2, %p298_p1  ;;  %s283_s28 = ssub.s32 %s1568_s21, %s1863_s25 }
   0xd   : > { %p1239_p6 = scmp.ge.s32.totalorder %s1572_s22, 1  ;;  %p286_p7 = scmp.eq.s32.totalorder %s283_s28, 0 }
   0xe   : > { %p1685_p8 = por %p305_p5, %p304_p3  ;;  %p369_p9 = scmp.lt.s32.totalorder %s1572_s22, 3 }
   0xf   : > { %s1691_s30 = scalar_select %p286_p7, %s1560_s19, %s288_s26  }
  0x10   : > { %p370_p10 = pnand %p1239_p6, %p369_p9 }
  0x11   : > { %p417_p11 = scmp.lt.s32.totalorder (!%p370_p10), %s1564_s20, 1  ;;  %s1855_s0 = sld [smem:[#allocation5_spill]] (!%p370_p10) }
  0x12   : > { %373 = sbr.rel (%p370_p10) target bundleno = 1077 (0x435), region = 64  ;;  %s1856_s1 = sld [smem:[#allocation6_spill]] (!%p370_p10) }
  0x17   : > { %v438_v0 = vld [vmem:[%s1841_s2] sm:$0x7]  ;;  %vm470_vm0 = vcmask 1042432   ;;  %v588_v1 = vld [vmem:[%s1842_s3 + $0x8] sm:$0xff]  ;;  %s1701_s16 = scalar_select %p417_p11, %s1564_s20, 1  ;;  %vm445_vm1 = vcmask 23552  }
  0x18   : > { %1346 = vmatprep.subr.msk.mxu0 %vm470_vm0, %v438_v0  ;;  %1435 = vmatprep.subr.msk.mxu1 %vm470_vm0, %v438_v0  ;;  %v587_v10 = vld [vmem:[%s1842_s3] sm:$0xff]  ;;  %v737_v11 = vld [vmem:[%s1844_s5 + $0x18] sm:$0xff]  ;;  %vm596_vm2 = vcmask 130048   ;;  %v736_v37 = vld [vmem:[%s1844_s5 + $0x10] sm:$0xff]  ;;  %vm745_vm3 = vcmask 261120   ;;  %vm1575_vm4 = vmmov 0  }
  0x19   : > { %1347 = vmatpush3.msk.msra.mxu0 %vm470_vm0, %v438_v0  ;;  %1436 = vmatpush3.msk.msra.mxu1 %vm470_vm0, %v438_v0  ;;  %s1293_s23 = sshll.u32 %s1701_s16, 6  ;;  %s428_s26 = scalar_lea.vmem %s1856_s1, %s1701_s16  ;;  %v735_v38 = vld [vmem:[%s1844_s5 + $0x8] sm:$0xff]  ;;  %v734_v39 = vld [vmem:[%s1844_s5] sm:$0xff]  ;;  %v886_v40 = vld [vmem:[%s1846_s7 + $0x18] sm:$0xff]  ;;  %vm1135_vm5 = vcmask 523264  }
  0x1a   : > { %1360 = vmatprep.subr.mxu1 %v588_v1  ;;  %s424_s28 = scalar_lea.vmem %s1855_s0, %s1293_s23  ;;  %1376 = vmatprep.subr.mxu0 %v737_v11  ;;  %v1243_v12 = vld [vmem:[%s428_s26] ss:$0 sm:$0xff]  ;;  %v885_v41 = vld [vmem:[%s1846_s7 + $0x10] sm:$0xff]  ;;  %v884_v42 = vld [vmem:[%s1846_s7 + $0x8] sm:$0xff]  ;;  %s413_s23 = sand.u32 1, %s1556_s18  }
  0x1b   : > { %v429_v2 = vld [vmem:[%s424_s28] sm:$0xff]  ;;  %v430_v3 = vld [vmem:[%s424_s28 + $0x8] sm:$0xff]  ;;  %v431_v4 = vld [vmem:[%s424_s28 + $0x10] sm:$0xff]  ;;  %s1240_s24 = sshll.u32 %s413_s23, 3  ;;  %s1290_s26 = sshll.u32 %s1564_s20, 7 }
  0x1c   : > { %1348 = vmatprep.mubr.msk.f32.mxu0 %vm445_vm1, %v429_v2  ;;  %v433_v5 = vld [vmem:[%s424_s28 + $0x20] sm:$0xff]  ;;  %v434_v6 = vld [vmem:[%s424_s28 + $0x28] sm:$0xff]  ;;  %v435_v7 = vld [vmem:[%s424_s28 + $0x30] sm:$0xff]  ;;  %s415_s16 = scalar_lea.vmem [#allocation2], %s1240_s24  ;;  %s1799_s0 = scalar_lea.hbm %s1850_s11, %s1290_s26 }
  0x1d   : > { %1349 = vmatmul.mubr.msk.f32.vlgmr.msra.gmra.mxu0 %vm445_vm1, %v430_v3  ;;  %1354 = vmatprep.mubr.msk.f32.mxu1 %vm445_vm1, %v433_v5  ;;  %v432_v8 = vld [vmem:[%s424_s28 + $0x18] sm:$0xff]  ;;  %v1253_v43 = vld [vmem:[%s1843_s4] ss:$0 sm:$0xff]  ;;  %s1138_s14 = scalar_lea.sflag [#allocation3], %s413_s23  ;;  %s1577_s20 = smov [#allocation2]  }
  0x1e   : > { %1351 = vmatprep.mubr.msk.f32.mxu0 %vm445_vm1, %v431_v4  ;;  %1355 = vmatmul.mubr.msk.f32.vlgmr.msra.gmra.mxu1 %vm445_vm1, %v434_v6  ;;  %v436_v9 = vld [vmem:[%s424_s28 + $0x38] sm:$0xff]  ;;  %v883_v4 = vld [vmem:[%s1846_s7] sm:$0xff]  ;;  %s1152_s28 = sshll.u32 %s415_s16, 4  ;;  %s1500_s24 = sshll.u32 %s1577_s20, 4  ;;  %s1153_s28 = int_to_ptr.vmem [resolvable:$true] %s1152_s28  ;;  %s1501_s24 = int_to_ptr.vmem [resolvable:$false] %s1500_s24 }
  0x1f   : > { %1357 = vmatprep.mubr.msk.f32.mxu1 %vm445_vm1, %v435_v7  ;;  %1361 = vmatpush3.msra.mxu1 %v588_v1  ;;  %v1262_v5 = vld [vmem:[%s1845_s6] ss:$0 sm:$0xff]  ;;  %s1496_s15 = scalar_lea.vmem %s1153_s28, 128  ;;  %s1502_s1 = scalar_lea.vmem %s1501_s24, 256 }
  0x20   : > { %1362 = vmatprep.subr.mxu1 %v587_v10  ;;  %1377 = vmatpush3.msra.mxu0 %v737_v11  ;;  %p1497_p12 = scmp.ne.s32.totalorder %s1153_s28, %s1496_s15  ;;  %p1503_p1 = scmp.lt.s32.totalorder %s1153_s28, %s1501_s24 }
  0x21   : > { %1352 = vmatmul.mubr.msk.f32.gmra.mxu0 %vm445_vm1, %v432_v8  ;;  %1363 = vmatpush3.msra.mxu1 %v587_v10  ;;  %p1504_p2 = scmp.lt.s32.totalorder %s1502_s1, %s1496_s15 }
  0x22   : > { %1358 = vmatmul.mubr.msk.f32.gmra.mxu1 %vm445_vm1, %v436_v9  ;;  %1378 = vmatprep.subr.mxu0 %v736_v37  ;;  %p1498_p13 = pnand %p1497_p12, %p1678_p4 }
  0x23   : > { %1379 = vmatpush3.msra.mxu0 %v736_v37  ;;  %1396 = vmatprep.subr.mxu1 %v886_v40  ;;  %p1505_p3 = por %p1504_p2, %p1503_p1 }
  0x24   : > { %1380 = vmatprep.subr.mxu0 %v735_v38  ;;  %p1499_p0 = pneg %p1498_p13 }
  0x25   : > { %1381 = vmatpush3.msra.mxu0 %v735_v38 }
  0x26   : > { %1382 = vmatprep.subr.mxu0 %v734_v39  ;;  %p1506_p5 = pnand %p1505_p3, %p1499_p0 }
  0x27   : > { %1383 = vmatpush3.msra.mxu0 %v734_v39  ;;  %v1271_v39 = vld [vmem:[%s1847_s8] ss:$0 sm:$0xff] }
  0xdd   : > { %v1350_v13 = vpop.f32.mrf.mxu0 }
  0xde   : > { %v1356_v14 = vpop.f32.mrf.mxu1  ;;  %v546_v15 = vadd.f32 %v1350_v13, %v1243_v12 }
  0xdf   : > { %v540_v16 = vpop.f32.mrf.mxu0  ;;  %v566_v32 = vadd.f32 %v1356_v14, %v1243_v12 }
  0xe0   : > { %v541_v17 = vadd.f32 %v1243_v12, %v540_v16  ;;  %v560_v18 = vpop.f32.mrf.mxu1  ;;  %v580_v23 = vmax.f32 %v546_v15, 0.0 }
  0xe1   : > { %v1353_v19 = vpop.f32.mrf.mxu0  ;;  %v561_v21 = vadd.f32 %v1243_v12, %v560_v18  ;;  %v584_v34 = vmax.f32 %v566_v32, 0.0  ;;  %v1576_v32 = vmov 0  }
  0xe2   : > { %v579_v20 = vmax.f32 %v541_v17, 0.0  ;;  %v1359_v22 = vpop.f32.mrf.mxu1  ;;  %v556_v24 = vadd.f32 %v1353_v19, %v1243_v12  ;;  %1495 = vset.pattern.permute.xlu0 %v1576_v32 }
  0xe3   : > { %v550_v25 = vpop.f32.mrf.mxu0  ;;  %v583_v29 = vmax.f32 %v561_v21, 0.0  ;;  %v576_v35 = vadd.f32 %v1359_v22, %v1243_v12 }
  0xe4   : > { %v551_v26 = vadd.f32 %v1243_v12, %v550_v25  ;;  %1364 = vmatprep.mubr.msk.f32.mxu1 %vm596_vm2, %v579_v20  ;;  %v570_v27 = vpop.f32.mrf.mxu1  ;;  %v582_v31 = vmax.f32 %v556_v24, 0.0 }
  0xe5   : > { %1365 = vmatmul.mubr.msk.f32.vlgmr.msra.gmra.mxu1 %vm596_vm2, %v580_v23  ;;  %v571_v30 = vadd.f32 %v1243_v12, %v570_v27  ;;  %v586_v36 = vmax.f32 %v576_v35, 0.0 }
  0xe6   : > { %v581_v28 = vmax.f32 %v551_v26, 0.0  ;;  %1397 = vmatpush3.msra.mxu1 %v886_v40 }
  0xe7   : > { %v585_v33 = vmax.f32 %v571_v30, 0.0  ;;  %1398 = vmatprep.subr.mxu1 %v885_v41  ;;  %v1574_v30 = vmov 0.0  }
  0xe8   : > { %1367 = vmatprep.mubr.msk.f32.mxu1 %vm596_vm2, %v581_v28  ;;  %1399 = vmatpush3.msra.mxu1 %v885_v41 }
  0xe9   : > { %1368 = vmatmul.mubr.msk.f32.gmra.mxu1 %vm596_vm2, %v582_v31  ;;  %1400 = vmatprep.subr.mxu1 %v884_v42  ;;  %v1032_v31 = vld [vmem:[%s1849_s10] sm:$0xff] }
  0xea   : > { %1370 = vmatprep.mubr.msk.f32.mxu1 %vm596_vm2, %v583_v29  ;;  %1401 = vmatpush3.msra.mxu1 %v884_v42 }
  0xeb   : > { %1402 = vmatprep.subr.mxu1 %v883_v4  ;;  %1416 = vmatprep.subr.mxu0 %v1574_v30 }
  0xec   : > { %1403 = vmatpush3.msra.mxu1 %v883_v4  ;;  %1035 = vperm.xlu0 %1495, %v1032_v31  }
  0xed   : > { %1371 = vmatmul.mubr.msk.f32.gmra.mxu1 %vm596_vm2, %v584_v34 }
  0xee   : > { %1373 = vmatprep.mubr.msk.f32.mxu1 %vm596_vm2, %v585_v33 }
  0xf1   : > { %1374 = vmatmul.mubr.msk.f32.gmra.mxu1 %vm596_vm2, %v586_v36 }
 0x1a5   : > { %v1366_v44 = vpop.f32.mrf.mxu1 }
 0x1a6   : > { %v693_v45 = vadd.f32 %v1366_v44, %v1253_v43 }
 0x1a7   : > { %v687_v46 = vpop.f32.mrf.mxu1 }
 0x1a8   : > { %v688_v47 = vadd.f32 %v1253_v43, %v687_v46  ;;  %v727_v50 = vmax.f32 %v693_v45, 0.0 }
 0x1a9   : > { %v1369_v48 = vpop.f32.mrf.mxu1 }
 0x1aa   : > { %v726_v49 = vmax.f32 %v688_v47, 0.0  ;;  %v703_v51 = vadd.f32 %v1369_v48, %v1253_v43 }
 0x1ab   : > { %v697_v52 = vpop.f32.mrf.mxu1 }
 0x1ac   : > { %v698_v53 = vadd.f32 %v1253_v43, %v697_v52  ;;  %1384 = vmatprep.mubr.msk.f32.mxu0 %vm745_vm3, %v726_v49  ;;  %v729_v56 = vmax.f32 %v703_v51, 0.0 }
 0x1ad   : > { %v1372_v54 = vpop.f32.mrf.mxu1  ;;  %1385 = vmatmul.mubr.msk.f32.vlgmr.msra.gmra.mxu0 %vm745_vm3, %v727_v50 }
 0x1ae   : > { %v728_v55 = vmax.f32 %v698_v53, 0.0  ;;  %v713_v57 = vadd.f32 %v1372_v54, %v1253_v43 }
 0x1af   : > { %v707_v58 = vpop.f32.mrf.mxu1 }
 0x1b0   : > { %v708_v59 = vadd.f32 %v1253_v43, %v707_v58  ;;  %1387 = vmatprep.mubr.msk.f32.mxu0 %vm745_vm3, %v728_v55  ;;  %v731_v62 = vmax.f32 %v713_v57, 0.0  ;;  %v1031_v58 = vld [vmem:[%s1848_s9] sm:$0xff] }
 0x1b1   : > { %v1375_v60 = vpop.f32.mrf.mxu1  ;;  %1388 = vmatmul.mubr.msk.f32.gmra.mxu0 %vm745_vm3, %v729_v56 }
 0x1b2   : > { %v730_v61 = vmax.f32 %v708_v59, 0.0  ;;  %v723_v63 = vadd.f32 %v1375_v60, %v1253_v43  ;;  %v1036_v59 = vpop.permute.xlu0 %1035 }
 0x1b3   : > { %v717_v0 = vpop.f32.mrf.mxu1 }
 0x1b4   : > { %v718_v1 = vadd.f32 %v1253_v43, %v717_v0  ;;  %1390 = vmatprep.mubr.msk.f32.mxu0 %vm745_vm3, %v730_v61  ;;  %v733_v3 = vmax.f32 %v723_v63, 0.0 }
 0x1b5   : > { %1391 = vmatmul.mubr.msk.f32.gmra.mxu0 %vm745_vm3, %v731_v62 }
 0x1b6   : > { %v732_v2 = vmax.f32 %v718_v1, 0.0 }
 0x1b8   : > { %1393 = vmatprep.mubr.msk.f32.mxu0 %vm745_vm3, %v732_v2 }
 0x1b9   : > { %1394 = vmatmul.mubr.msk.f32.gmra.mxu0 %vm745_vm3, %v733_v3 }
 0x1ba   : > { %1432 = vmatprep.mubr.msk.f32.mxu0 %vm1575_vm4, %v1574_v30 }
 0x26d   : > { %v1386_v6 = vpop.f32.mrf.mxu0 }
 0x26e   : > { %v842_v7 = vadd.f32 %v1386_v6, %v1262_v5 }
 0x26f   : > { %v836_v8 = vpop.f32.mrf.mxu0 }
 0x270   : > { %v837_v9 = vadd.f32 %v1262_v5, %v836_v8  ;;  %v876_v12 = vmax.f32 %v842_v7, 0.0 }
 0x271   : > { %v1389_v10 = vpop.f32.mrf.mxu0 }
 0x272   : > { %v875_v11 = vmax.f32 %v837_v9, 0.0  ;;  %v852_v13 = vadd.f32 %v1389_v10, %v1262_v5 }
 0x273   : > { %v846_v14 = vpop.f32.mrf.mxu0 }
 0x274   : > { %v847_v15 = vadd.f32 %v1262_v5, %v846_v14  ;;  %1404 = vmatprep.mubr.msk.f32.mxu1 %vm745_vm3, %v875_v11  ;;  %v878_v18 = vmax.f32 %v852_v13, 0.0 }
 0x275   : > { %v1392_v16 = vpop.f32.mrf.mxu0  ;;  %1405 = vmatmul.mubr.msk.f32.vlgmr.msra.gmra.mxu1 %vm745_vm3, %v876_v12 }
 0x276   : > { %v877_v17 = vmax.f32 %v847_v15, 0.0  ;;  %v862_v19 = vadd.f32 %v1392_v16, %v1262_v5 }
 0x277   : > { %v856_v20 = vpop.f32.mrf.mxu0 }
 0x278   : > { %v857_v21 = vadd.f32 %v1262_v5, %v856_v20  ;;  %1407 = vmatprep.mubr.msk.f32.mxu1 %vm745_vm3, %v877_v17  ;;  %v880_v24 = vmax.f32 %v862_v19, 0.0 }
 0x279   : > { %v1395_v22 = vpop.f32.mrf.mxu0  ;;  %1408 = vmatmul.mubr.msk.f32.gmra.mxu1 %vm745_vm3, %v878_v18 }
 0x27a   : > { %v879_v23 = vmax.f32 %v857_v21, 0.0  ;;  %v872_v25 = vadd.f32 %v1395_v22, %v1262_v5 }
 0x27b   : > { %v866_v26 = vpop.f32.mrf.mxu0 }
 0x27c   : > { %v867_v27 = vadd.f32 %v1262_v5, %v866_v26  ;;  %1410 = vmatprep.mubr.msk.f32.mxu1 %vm745_vm3, %v879_v23  ;;  %v882_v29 = vmax.f32 %v872_v25, 0.0 }
 0x27d   : > { %1411 = vmatmul.mubr.msk.f32.gmra.mxu1 %vm745_vm3, %v880_v24 }
 0x27e   : > { %v881_v28 = vmax.f32 %v867_v27, 0.0 }
 0x280   : > { %1413 = vmatprep.mubr.msk.f32.mxu1 %vm745_vm3, %v881_v28 }
 0x281   : > { %1414 = vmatmul.mubr.msk.f32.gmra.mxu1 %vm745_vm3, %v882_v29 }
 0x335   : > { %v1406_v33 = vpop.f32.mrf.mxu1 }
 0x336   : > { %v990_v53 = vadd.f32 %v1406_v33, %v1271_v39 }
 0x337   : > { %v984_v34 = vpop.f32.mrf.mxu1 }
 0x338   : > { %v1024_v55 = vmax.f32 %v990_v53, 0.0  ;;  %v985_v56 = vadd.f32 %v1271_v39, %v984_v34 }
 0x339   : > { %v1409_v35 = vpop.f32.mrf.mxu1 }
 0x33a   : > { %v1000_v49 = vadd.f32 %v1409_v35, %v1271_v39  ;;  %v1023_v57 = vmax.f32 %v985_v56, 0.0 }
 0x33b   : > { %v994_v36 = vpop.f32.mrf.mxu1 }
 0x33c   : > { %v1026_v51 = vmax.f32 %v1000_v49, 0.0  ;;  %v995_v52 = vadd.f32 %v1271_v39, %v994_v36 }
 0x33d   : > { %v1412_v37 = vpop.f32.mrf.mxu1 }
 0x33e   : > { %v1010_v45 = vadd.f32 %v1412_v37, %v1271_v39  ;;  %v1025_v54 = vmax.f32 %v995_v52, 0.0 }
 0x33f   : > { %v1004_v38 = vpop.f32.mrf.mxu1 }
 0x340   : > { %v1028_v47 = vmax.f32 %v1010_v45, 0.0  ;;  %v1005_v48 = vadd.f32 %v1271_v39, %v1004_v38 }
 0x341   : > { %v1415_v40 = vpop.f32.mrf.mxu1 }
 0x342   : > { %v1020_v41 = vadd.f32 %v1415_v40, %v1271_v39  ;;  %v1027_v50 = vmax.f32 %v1005_v48, 0.0 }
 0x343   : > { %v1014_v42 = vpop.f32.mrf.mxu1 }
 0x344   : > { %v1030_v43 = vmax.f32 %v1020_v41, 0.0  ;;  %v1015_v44 = vadd.f32 %v1271_v39, %v1014_v42 }
 0x346   : > { %1417 = vmatpush3.xpose.msk.msra.mxu0 %vm745_vm3, %v1030_v43  ;;  %v1029_v46 = vmax.f32 %v1015_v44, 0.0 }
 0x347   : > { %1418 = vmatprep.subr.mxu0 %v1574_v30 }
 0x34a   : > { %1419 = vmatpush3.xpose.msk.msra.mxu0 %vm745_vm3, %v1029_v46 }
 0x34b   : > { %1420 = vmatprep.subr.mxu0 %v1574_v30 }
 0x34e   : > { %1421 = vmatpush3.xpose.msk.msra.mxu0 %vm745_vm3, %v1028_v47 }
 0x34f   : > { %1422 = vmatprep.subr.mxu0 %v1574_v30 }
 0x352   : > { %1423 = vmatpush3.xpose.msk.msra.mxu0 %vm745_vm3, %v1027_v50 }
 0x353   : > { %1424 = vmatprep.subr.mxu0 %v1574_v30 }
 0x356   : > { %1425 = vmatpush3.xpose.msk.msra.mxu0 %vm745_vm3, %v1026_v51 }
 0x357   : > { %1426 = vmatprep.subr.mxu0 %v1574_v30 }
 0x35a   : > { %1427 = vmatpush3.xpose.msk.msra.mxu0 %vm745_vm3, %v1025_v54 }
 0x35b   : > { %1428 = vmatprep.subr.mxu0 %v1574_v30 }
 0x35e   : > { %1429 = vmatpush3.xpose.msk.msra.mxu0 %vm745_vm3, %v1024_v55 }
 0x35f   : > { %1430 = vmatprep.subr.mxu0 %v1574_v30 }
 0x362   : > { %1431 = vmatpush3.xpose.msk.msra.mxu0 %vm745_vm3, %v1023_v57 }
 0x365   : > { %1433 = vmatmul.mubr.msk.f32.vlgmr.msra.gmra.mxu0 %vm745_vm3, %v1031_v58 }
 0x425   : > { %v1131_v60 = vpop.f32.mrf.mxu0 }
 0x426   : > { %v1132_v61 = vadd.f32 %v1131_v60, %v1036_v59 }
 0x427   : > { %v1434_v62 = vpop.f32.mrf.mxu0 }
 0x428   : > { %1136 = vst.msk [vmem:[%s415_s16] sm:$0xff] %vm1135_vm5, %v1132_v61 }
 0x429   : > { %1509 = shalt.err (!%p1506_p5)
}
 0x42a   : > { %s1510_s26 = scalar_lea.hbm %s1799_s0, 128  ;;  %s1514_s12 = scalar_lea.hbm %s1850_s11, 256 }
 0x42b   : > { %p1511_p6 = scmp.ne.s32.totalorder %s1799_s0, %s1510_s26  ;;  %p1515_p10 = scmp.lt.s32.totalorder %s1799_s0, %s1850_s11 }
 0x42c   : > { %p1516_p11 = scmp.lt.s32.totalorder %s1514_s12, %s1510_s26 }
 0x42d   : > { %p1512_p7 = pnand %p1511_p6, %p1678_p4 }
 0x42e   : > { %p1517_p12 = por %p1516_p11, %p1515_p10 }
 0x42f   : > { %p1513_p9 = pneg %p1512_p7 }
 0x431   : > { %p1518_p13 = pnand %p1517_p12, %p1513_p9 }
 0x433   : > { %1521 = shalt.err (!%p1518_p13)
}
 0x434   : > { %1437 = dma.vmem_to_hbm [thread:$0]  (%p1678_p4), %s1153_s28, 128, %s1799_s0, %s1138_s14  }
 0x435 PF: > { %p1443_p0 = scmp.ge.s32.totalorder %s1572_s22, 2  ;;  %s1164_s1 = sand.u32 1, %s1552_s17  }
 0x436   : > { %s1165_s15 = scalar_lea.sflag [#allocation3], %s1164_s1 }
 0x437   : > { %p1440_p1 = pnand %p1443_p0, %p1685_p8 }
 0x439   : > { %p1441_p2 = pneg %p1440_p1 }
 0x43b   : > { %1547 = dma.done.wait (%p1441_p2), %s1165_s15, 128  }
 0x43c   : > { %1549 = vsyncadd (%p1441_p2), %s1165_s15, 4294967168  ;;  %s24_s22 = sadd.s32 1, %s1572_s22   ;;  %s1857_s17 = smov %s1556_s18 }
 0x43d   : > { %p21_p3 = scmp.ge.s32.totalorder %s24_s22, 4   ;;  %s1858_s18 = smov %s1560_s19 }
 0x43e   : > { %s1859_s19 = smov %s1691_s30  ;;  %s1860_s20 = smov %s1568_s21 }
 0x43f   : > { %s1861_s21 = smov %s1863_s25  ;;  %23 = sbr.rel (!%p21_p3) target bundleno = 7 (0x7), region = 102 }
 0x444   :  { %1170 = vsyncpa [#allocation3], 1 }
 0x445   :  { %1172 = vsyncpa [#allocation3 + $0x1], 1 }

</bundles_post_ra>
